<compile_context>
chip_gen: v7x
topology: tpu7x:2x2x1
jax: 0.10.0
libtpu: 0.0.40
codegen_flags: <defaults>
</compile_context>

<pallas_src>
import math
from functools import partial

import jax
import jax.numpy as jnp
from jax.experimental import pallas as pl
from jax.experimental.pallas import tpu as pltpu

LANE = 128                 # feature dims padded to a multiple of this
SUBLANE = 8                # batch padded to a multiple of this
MAX_TILE_B = 512           # target batch tile (amortizes ~0.35us/grid-step overhead)
SINGLE_BLOCK_MAX_B = 128   # at/below this padded batch: no grid at all
MIN_GRID_TILES = 2         # >=2 tiles so v7x's 2 TensorCores both get work

# TODO(synk): networks whose padded bf16 weight stack exceeds the VMEM budget
# (v7x: ~48 MiB) would need a K/N-tiled inner loop (pltpu.emit_pipeline) instead
# of the all-weights-resident design; not needed for these layer sizes.
# TODO(synk): on v6e/v7x (2x256^2 MXU) padding hot dims to 256 instead of 128
# would improve MXU utilization for true widths in (128, 256]; kept at 128.


def _round_up(n, m):
    return ((n + m - 1) // m) * m


def _cdiv(a, b):
    return -(-a // b)


def _vmem_budget_bytes():
    """Generation-aware VMEM budget: ~3/4 of physical, never the full capacity.

    v7x (64 MiB/TC) -> ~48 MiB, v5e/v6e (128 MiB) -> ~96 MiB, unknown -> 48 MiB.
    """
    cap = None
    try:
        info = pltpu.get_tpu_info()
        cap = getattr(info, "vmem_capacity_bytes", None)
    except Exception:
        cap = None
    if cap is None:
        cap = 64 * 1024 * 1024      # assume the smallest part (v7x: 64 MiB / TC)
    budget = (cap * 3) // 4          # headroom for compiler internal scratch
    return int(max(32 * 1024 * 1024, min(budget, 100 * 1024 * 1024)))


# ----------------------------------------------------------------------------
# Fused MLP kernel: chain of (x @ W + b) -> LeakyReLU, all inside one body.
#   refs = (x_ref, w0_ref, b0_ref, w1_ref, b1_ref, ..., o_ref)
#   Weights arrive as bf16 (MXU fast path); accumulation + epilogue are fp32;
#   inter-layer activations are carried in bf16 to halve live vreg/VMEM bytes.
# ----------------------------------------------------------------------------
def _mlp_fused_kernel(*refs, num_layers, negative_slope, act_last):
    x_ref = refs[0]
    o_ref = refs[-1]
    wb = refs[1:-1]

    h = x_ref[...].astype(jnp.bfloat16)          # (TB, Din_p) bf16 (no-op if bf16 in)
    for i in range(num_layers):
        w = wb[2 * i][...]                        # (Din_p, Dout_p) bf16
        b = wb[2 * i + 1][...]                    # (1, Dout_p)     f32
        y = jnp.dot(h, w, preferred_element_type=jnp.float32) + b
        if (i < num_layers - 1) or act_last:
            # LeakyReLU in fp32 (negative_slope=0 gives plain ReLU)
            y = jnp.where(y >= 0, y, negative_slope * y)
        h = y.astype(jnp.bfloat16) if i < num_layers - 1 else y
    o_ref[...] = h.astype(o_ref.dtype)


# ----------------------------------------------------------------------------
# Parameter prep: zero-pad every (w, b) to lane-dense shapes, cast w to bf16.
# Zero padding is exact: padded input columns of W are zero rows, padded output
# columns have zero weights + zero bias, and LeakyReLU(0) == 0, so padding
# propagates as zeros through the whole stack.
# ----------------------------------------------------------------------------
def prepare_padded_params(params):
    padded = []
    for w, b in params:
        din, dout = w.shape
        din_p, dout_p = _round_up(din, LANE), _round_up(dout, LANE)
        w_p = jnp.zeros((din_p, dout_p), jnp.float32).at[:din, :dout].set(w)
        b_p = jnp.zeros((1, dout_p), jnp.float32).at[0, :dout].set(b)
        padded.append((w_p.astype(jnp.bfloat16), b_p))
    return padded


# ----------------------------------------------------------------------------
# MLP forward: ONE fused Pallas kernel for the whole network.
#   - small batch: single full-array VMEM block, no grid
#   - larger batch: batch-tiled "parallel" grid (>=2 tiles for megacore),
#     weights single-buffered, activations streamed (bf16 when padding anyway)
# ----------------------------------------------------------------------------
def mlp_forward(x, params, *, negative_slope=0.1, with_output_nonlinearity=True):
    # batchNorm=False, drop_ratio=0.0 (module defaults) -> only Linear + LeakyReLU.
    # TODO(synk): BatchNorm1d / Dropout branches not instantiated (module defaults off).
    B, Din = x.shape
    Dout = params[-1][0].shape[1]
    n_layers = len(params)

    padded = prepare_padded_params(params)
    din_p = padded[0][0].shape[0]
    dout_p = padded[-1][0].shape[1]
    widths_p = [w.shape[1] for w, _ in padded]

    # Weights/biases are single-buffered (constant index_map) -> count once.
    weight_bytes = sum(w.size * w.dtype.itemsize + b.size * b.dtype.itemsize
                       for w, b in padded)
    budget = _vmem_budget_bytes()

    b8 = _round_up(B, SUBLANE)
    use_grid = b8 > SINGLE_BLOCK_MAX_B

    if use_grid:
        # Per-row VMEM cost: double-buffered x/out tiles + live fp32 intermediate.
        x_stream_itemsize = 2 if (din_p != Din or x.dtype == jnp.bfloat16) else x.dtype.itemsize
        per_row = 2 * din_p * x_stream_itemsize + 2 * dout_p * 4 + max(widths_p) * 4
        usable = max(budget - weight_bytes, per_row * SUBLANE)
        tile_cap = max(SUBLANE, (usable // per_row) // SUBLANE * SUBLANE)
        tile_target = max(SUBLANE, min(MAX_TILE_B, tile_cap))
        n_tiles = max(MIN_GRID_TILES, _cdiv(b8, tile_target))
        tile_b = _round_up(_cdiv(b8, n_tiles), SUBLANE)
        b_p = n_tiles * tile_b
    else:
        tile_b = b_p = b8
        n_tiles = 1

    # Only pad when unavoidable; when we do pad, fuse the bf16 cast into it so
    # the kernel streams half the activation bytes (biggest win on v5e HBM BW).
    if (b_p != B) or (din_p != Din):
        x_in = jnp.zeros((b_p, din_p), jnp.bfloat16).at[:B, :Din].set(
            x.astype(jnp.bfloat16))
    else:
        x_in = x  # already aligned: stream as-is, kernel casts in-vreg

    flat_wb = []
    for w_p, bias_p in padded:
        flat_wb += [w_p, bias_p]

    kernel = partial(
        _mlp_fused_kernel,
        num_layers=n_layers,
        negative_slope=negative_slope,
        act_last=with_output_nonlinearity,
    )
    out_shape = jax.ShapeDtypeStruct((b_p, dout_p), x.dtype)

    if n_tiles == 1:
        # No grid: everything is one lane-dense VMEM block (tiny problem).
        vmem = pl.BlockSpec(memory_space=pltpu.MemorySpace.VMEM)
        out_p = pl.pallas_call(
            kernel,
            out_shape=out_shape,
            in_specs=[vmem] * (1 + 2 * n_layers),
            out_specs=vmem,
            compiler_params=pltpu.CompilerParams(vmem_limit_bytes=budget),
        )(x_in, *flat_wb)
    else:
        def _grid_call(single_buffer_weights):
            wb_kw = ({"pipeline_mode": pl.Buffered(1)}
                     if single_buffer_weights else {})
            in_specs = [pl.BlockSpec((tile_b, din_p), lambda i: (i, 0))]
            for w_p, bias_p in padded:
                in_specs.append(pl.BlockSpec(w_p.shape, lambda i: (0, 0), **wb_kw))
                in_specs.append(pl.BlockSpec(bias_p.shape, lambda i: (0, 0), **wb_kw))
            out_specs = pl.BlockSpec((tile_b, dout_p), lambda i: (i, 0))
            return pl.pallas_call(
                kernel,
                out_shape=out_shape,
                grid=(n_tiles,),
                in_specs=in_specs,
                out_specs=out_specs,
                compiler_params=pltpu.CompilerParams(
                    dimension_semantics=("parallel",),
                    vmem_limit_bytes=budget,
                ),
            )(x_in, *flat_wb)

        try:
            out_p = _grid_call(True)   # single-buffered constant weight blocks
        except Exception:
            # Fallback if this JAX build rejects Buffered(1) on top-level specs.
            out_p = _grid_call(False)

    if (b_p != B) or (dout_p != Dout):
        out_p = out_p[:B, :Dout]
    return out_p


# ----------------------------------------------------------------------------
# MLP parameter initialization (mirrors the PyTorch module's reset_parameters)
# ----------------------------------------------------------------------------
def init_mlp_params(key, in_features, out_features, hidden_features,
                    negative_slope=0.1, nonlinearity="leaky_relu"):
    if hidden_features:
        in_dims = [in_features] + list(hidden_features)
        out_dims = list(hidden_features) + [out_features]
    else:
        in_dims = [in_features]
        out_dims = [out_features]

    params = []
    for din, dout in zip(in_dims, out_dims):
        key, kw, kb = jax.random.split(key, 3)
        if nonlinearity == "leaky_relu":
            gain = math.sqrt(2.0 / (1.0 + negative_slope ** 2))
        else:  # relu
            gain = math.sqrt(2.0)
        bound = gain * math.sqrt(3.0 / din)
        # torch stores weight as (out, in); we store transposed (in, out).
        w = jax.random.uniform(kw, (din, dout), jnp.float32, -bound, bound)
        b = jax.random.uniform(kb, (dout,), jnp.float32, 0.0, 0.1)
        params.append((w, b))
    return params


# ----------------------------------------------------------------------------
# Reference (pure JAX), mirroring the kernel's bf16-operand / fp32-accumulate
# math with bf16 inter-layer activations.
# ----------------------------------------------------------------------------
def mlp_reference(x, params, *, negative_slope=0.1, with_output_nonlinearity=True):
    n = len(params)
    h = x.astype(jnp.bfloat16)
    y = None
    for i, (w, b) in enumerate(params):
        y = jnp.dot(h, w.astype(jnp.bfloat16),
                    preferred_element_type=jnp.float32) + b
        if (i != n - 1) or with_output_nonlinearity:
            y = jnp.where(y >= 0, y, negative_slope * y)
        h = y.astype(jnp.bfloat16)
    return y


if __name__ == "__main__":
    key = jax.random.PRNGKey(0)
    k_params, k_x, k_x2 = jax.random.split(key, 3)

    batch = 8
    in_features = 16
    hidden_features = [32, 32]
    out_features = 8
    negative_slope = 0.1

    params = init_mlp_params(k_params, in_features, out_features,
                             hidden_features, negative_slope=negative_slope)
    x = jax.random.normal(k_x, (batch, in_features), jnp.float32)

    # Small batch: single fused kernel, no grid.
    out = mlp_forward(x, params, negative_slope=negative_slope,
                      with_output_nonlinearity=True)
    out = jax.block_until_ready(out)
    ref = mlp_reference(x, params, negative_slope=negative_slope,
                        with_output_nonlinearity=True)
    assert out.shape == (batch, out_features)
    assert jnp.allclose(out, ref, atol=1e-4, rtol=1e-3)

    # Larger batch: exercises the batch-tiled "parallel" grid path
    # (2 tiles of 304 rows, only 8 padded rows, single-buffered weights).
    big_batch = 600
    x2 = jax.random.normal(k_x2, (big_batch, in_features), jnp.float32)
    out2 = mlp_forward(x2, params, negative_slope=negative_slope,
                       with_output_nonlinearity=True)
    out2 = jax.block_until_ready(out2)
    ref2 = mlp_reference(x2, params, negative_slope=negative_slope,
                         with_output_nonlinearity=True)
    assert out2.shape == (big_batch, out_features)
    assert jnp.allclose(out2, ref2, atol=1e-4, rtol=1e-3)

    print("KERNEL_OK")
</pallas_src>

<mosaic_0001>
module attributes {stable_mosaic.version = 11 : i64} {
  func.func @_mlp_fused_kernel(%arg0: memref<8x128xbf16, #tpu.memory_space<vmem>>, %arg1: memref<128x128xbf16, #tpu.memory_space<vmem>>, %arg2: memref<1x128xf32, #tpu.memory_space<vmem>>, %arg3: memref<128x128xbf16, #tpu.memory_space<vmem>>, %arg4: memref<1x128xf32, #tpu.memory_space<vmem>>, %arg5: memref<128x128xbf16, #tpu.memory_space<vmem>>, %arg6: memref<1x128xf32, #tpu.memory_space<vmem>>, %arg7: memref<8x128xf32, #tpu.memory_space<vmem>>) attributes {dimension_semantics = [], scalar_prefetch = 0 : i64, scratch_operands = 0 : i64, tpu.core_type = #tpu.core_type<tc>} {
    %c0 = arith.constant 0 : index
    %c0_0 = arith.constant 0 : index
    %0 = vector.load %arg0[%c0, %c0_0] : memref<8x128xbf16, #tpu.memory_space<vmem>>, vector<8x128xbf16>
    %c0_1 = arith.constant 0 : index
    %c0_2 = arith.constant 0 : index
    %1 = vector.load %arg1[%c0_1, %c0_2] : memref<128x128xbf16, #tpu.memory_space<vmem>>, vector<128x128xbf16>
    %c0_3 = arith.constant 0 : index
    %c0_4 = arith.constant 0 : index
    %2 = vector.load %arg2[%c0_3, %c0_4] : memref<1x128xf32, #tpu.memory_space<vmem>>, vector<1x128xf32>
    %cst = arith.constant dense<0.000000e+00> : vector<8x128xf32>
    %3 = tpu.matmul %0, %1, %cst {dimension_numbers = #tpu.dot_dimension_numbers<[1], [0], [0], [1], [0, 0, 1, 1], [], []>} : vector<8x128xbf16>, vector<128x128xbf16>, vector<8x128xf32> -> vector<8x128xf32>
    %4 = vector.broadcast %2 : vector<1x128xf32> to vector<8x128xf32>
    %5 = arith.addf %3, %4 : vector<8x128xf32>
    %cst_5 = arith.constant 0.000000e+00 : f32
    %6 = vector.broadcast %cst_5 : f32 to vector<8x128xf32>
    %7 = arith.cmpf oge, %5, %6 : vector<8x128xf32>
    %cst_6 = arith.constant 1.000000e-01 : f32
    %8 = vector.broadcast %cst_6 : f32 to vector<8x128xf32>
    %9 = arith.mulf %8, %5 : vector<8x128xf32>
    %10 = arith.select %7, %5, %9 : vector<8x128xi1>, vector<8x128xf32>
    %11 = arith.truncf %10 : vector<8x128xf32> to vector<8x128xbf16>
    %c0_7 = arith.constant 0 : index
    %c0_8 = arith.constant 0 : index
    %12 = vector.load %arg3[%c0_7, %c0_8] : memref<128x128xbf16, #tpu.memory_space<vmem>>, vector<128x128xbf16>
    %c0_9 = arith.constant 0 : index
    %c0_10 = arith.constant 0 : index
    %13 = vector.load %arg4[%c0_9, %c0_10] : memref<1x128xf32, #tpu.memory_space<vmem>>, vector<1x128xf32>
    %cst_11 = arith.constant dense<0.000000e+00> : vector<8x128xf32>
    %14 = tpu.matmul %11, %12, %cst_11 {dimension_numbers = #tpu.dot_dimension_numbers<[1], [0], [0], [1], [0, 0, 1, 1], [], []>} : vector<8x128xbf16>, vector<128x128xbf16>, vector<8x128xf32> -> vector<8x128xf32>
    %15 = vector.broadcast %13 : vector<1x128xf32> to vector<8x128xf32>
    %16 = arith.addf %14, %15 : vector<8x128xf32>
    %cst_12 = arith.constant 0.000000e+00 : f32
    %17 = vector.broadcast %cst_12 : f32 to vector<8x128xf32>
    %18 = arith.cmpf oge, %16, %17 : vector<8x128xf32>
    %cst_13 = arith.constant 1.000000e-01 : f32
    %19 = vector.broadcast %cst_13 : f32 to vector<8x128xf32>
    %20 = arith.mulf %19, %16 : vector<8x128xf32>
    %21 = arith.select %18, %16, %20 : vector<8x128xi1>, vector<8x128xf32>
    %22 = arith.truncf %21 : vector<8x128xf32> to vector<8x128xbf16>
    %c0_14 = arith.constant 0 : index
    %c0_15 = arith.constant 0 : index
    %23 = vector.load %arg5[%c0_14, %c0_15] : memref<128x128xbf16, #tpu.memory_space<vmem>>, vector<128x128xbf16>
    %c0_16 = arith.constant 0 : index
    %c0_17 = arith.constant 0 : index
    %24 = vector.load %arg6[%c0_16, %c0_17] : memref<1x128xf32, #tpu.memory_space<vmem>>, vector<1x128xf32>
    %cst_18 = arith.constant dense<0.000000e+00> : vector<8x128xf32>
    %25 = tpu.matmul %22, %23, %cst_18 {dimension_numbers = #tpu.dot_dimension_numbers<[1], [0], [0], [1], [0, 0, 1, 1], [], []>} : vector<8x128xbf16>, vector<128x128xbf16>, vector<8x128xf32> -> vector<8x128xf32>
    %26 = vector.broadcast %24 : vector<1x128xf32> to vector<8x128xf32>
    %27 = arith.addf %25, %26 : vector<8x128xf32>
    %cst_19 = arith.constant 0.000000e+00 : f32
    %28 = vector.broadcast %cst_19 : f32 to vector<8x128xf32>
    %29 = arith.cmpf oge, %27, %28 : vector<8x128xf32>
    %cst_20 = arith.constant 1.000000e-01 : f32
    %30 = vector.broadcast %cst_20 : f32 to vector<8x128xf32>
    %31 = arith.mulf %30, %27 : vector<8x128xf32>
    %32 = arith.select %29, %27, %31 : vector<8x128xi1>, vector<8x128xf32>
    %c0_21 = arith.constant 0 : index
    %c0_22 = arith.constant 0 : index
    %33 = vector.load %arg7[%c0_21, %c0_22] : memref<8x128xf32, #tpu.memory_space<vmem>>, vector<8x128xf32>
    tpu.vector_store %arg7[%c0_21, %c0_22], %32 {strides = array<i32>} : memref<8x128xf32, #tpu.memory_space<vmem>>, vector<8x128xf32>,
    return
  }
}

</mosaic_0001>

<bundles_post_ra>
// kernel: tpu_custom_call.1
= control target key start
LH: loop header
LB: loop body
LE: loop exit
PB: predicated region body
PF: predicated region fallthrough
CT: control target
= control target key end

     0   :  { %12 = vsyncpa [#allocation3], 0  ;;  %s866_s0 = inlined_call_operand.hbm [shape: bf16[8,128], index: 0, kind: input, shape index: {}]   ;;  %s867_s1 = inlined_call_operand.hbm [shape: bf16[128,128], index: 1, kind: input, shape index: {}]   ;;  %s868_s2 = inlined_call_operand.vmem [shape: f32[1,128], index: 2, kind: input, shape index: {}]   ;;  %s869_s3 = inlined_call_operand.hbm [shape: bf16[128,128], index: 3, kind: input, shape index: {}]   ;;  %s870_s4 = inlined_call_operand.vmem [shape: f32[1,128], index: 4, kind: input, shape index: {}]   ;;  %s871_s5 = inlined_call_operand.hbm [shape: bf16[128,128], index: 5, kind: input, shape index: {}]   ;;  %s872_s6 = inlined_call_operand.vmem [shape: f32[1,128], index: 6, kind: input, shape index: {}]   ;;  %s873_s7 = inlined_call_operand.hbm [shape: f32[8,128], index: 7, kind: output, shape index: {}]  }
   0x1   :  { %13 = vsyncpa [#allocation6], 0 }
   0x2   :  { %14 = vsyncpa [#allocation9], 0 }
   0x3   :  { %15 = vsyncpa [#allocation4], 0  ;;  %s709_s24 = smov [#allocation5]   ;;  %s591_s28 = scalar_lea.hbm %s867_s1, 1024 }
   0x4   :  { %s31_s25 = sshll.u32 %s709_s24, 4  ;;  %p592_p0 = scmp.ne.s32.totalorder %s867_s1, %s591_s28  ;;  %s32_s25 = int_to_ptr.vmem [resolvable:$true] %s31_s25 }
   0x5   :  { %p595_p1 = scmp.lt.u32.totalorder %s591_s28, %s867_s1 }
   0x7   :  { %p597_p2 = pnand %p595_p1, %p592_p0 }
   0x9   :  { %600 = shalt.err (!%p597_p2)
}
   0xa   :  { %s601_s10 = scalar_lea.vmem %s32_s25, 1024  ;;  %p606_p4 = scmp.lt.s32.totalorder %s32_s25, %s32_s25 }
   0xb   :  { %p602_p3 = scmp.ne.s32.totalorder %s32_s25, %s601_s10  ;;  %p607_p5 = scmp.lt.s32.totalorder %s601_s10, %s601_s10 }
   0xd   :  { %p608_p6 = por %p607_p5, %p606_p4 }
   0xf   :  { %p609_p7 = pnand %p608_p6, %p602_p3 }
  0x11   :  { %612 = shalt.err (!%p609_p7)
}
  0x12   :  { %s710_s11 = smov 64   ;;  %s711_s12 = smov 4  }
  0x13   :  { %37 = dma.hbm_to_vmem [thread:$0]  %s867_s1, 1024, %s32_s25, [#allocation6], %s710_s11, %s710_s11, %s711_s12  }
  0x14   :  { %s712_s15 = smov [#allocation2]   ;;  %s713_s17 = smov [#allocation7]  }
  0x15   :  { %s22_s16 = sshll.u32 %s712_s15, 4  ;;  %s45_s18 = sshll.u32 %s713_s17, 4  ;;  %s23_s16 = int_to_ptr.vmem [resolvable:$true] %s22_s16  ;;  %s46_s18 = int_to_ptr.vmem [resolvable:$true] %s45_s18 }
  0x16   :  { %s613_s21 = scalar_lea.hbm %s866_s0, 64 }
  0x17   :  { %p614_p8 = scmp.ne.s32.totalorder %s866_s0, %s613_s21  ;;  %p617_p9 = scmp.lt.u32.totalorder %s613_s21, %s866_s0 }
  0x19   :  { %p619_p10 = pnand %p617_p9, %p614_p8 }
  0x1b   :  { %622 = shalt.err (!%p619_p10)
}
  0x1c   :  { %s623_s1 = scalar_lea.vmem %s23_s16, 64  ;;  %p628_p12 = scmp.lt.s32.totalorder %s23_s16, %s23_s16 }
  0x1d   :  { %p624_p11 = scmp.ne.s32.totalorder %s23_s16, %s623_s1  ;;  %p629_p13 = scmp.lt.s32.totalorder %s623_s1, %s623_s1 }
  0x1f   :  { %p630_p0 = por %p629_p13, %p628_p12 }
  0x21   :  { %p631_p1 = pnand %p630_p0, %p624_p11 }
  0x23   :  { %634 = shalt.err (!%p631_p1)
}
  0x24   :  { %25 = dma.hbm_to_vmem [thread:$0]  %s866_s0, 64, %s23_s16, [#allocation3]  }
  0x25   :  { %s635_s30 = scalar_lea.hbm %s869_s3, 1024 }
  0x26   :  { %p636_p2 = scmp.ne.s32.totalorder %s869_s3, %s635_s30  ;;  %p639_p3 = scmp.lt.u32.totalorder %s635_s30, %s869_s3 }
  0x28   :  { %p641_p4 = pnand %p639_p3, %p636_p2 }
  0x2a   :  { %644 = shalt.err (!%p641_p4)
}
  0x2b   :  { %s645_s14 = scalar_lea.vmem %s46_s18, 1024  ;;  %p650_p6 = scmp.lt.s32.totalorder %s46_s18, %s46_s18 }
  0x2c   :  { %p646_p5 = scmp.ne.s32.totalorder %s46_s18, %s645_s14  ;;  %p651_p7 = scmp.lt.s32.totalorder %s645_s14, %s645_s14 }
  0x2e   :  { %p652_p8 = por %p651_p7, %p650_p6 }
  0x30   :  { %p653_p9 = pnand %p652_p8, %p646_p5 }
  0x32   :  { %656 = shalt.err (!%p653_p9)
}
  0x33   :  { %51 = dma.hbm_to_vmem [thread:$0]  %s869_s3, 1024, %s46_s18, [#allocation6], %s710_s11, %s710_s11, %s711_s12  }
  0x34   :  { %s714_s16 = smov [#allocation8]   ;;  %s657_s21 = scalar_lea.hbm %s871_s5, 1024 }
  0x35   :  { %s59_s17 = sshll.u32 %s714_s16, 4  ;;  %p658_p10 = scmp.ne.s32.totalorder %s871_s5, %s657_s21  ;;  %s60_s17 = int_to_ptr.vmem [resolvable:$true] %s59_s17 }
  0x36   :  { %p661_p11 = scmp.lt.u32.totalorder %s657_s21, %s871_s5 }
  0x38   :  { %p663_p12 = pnand %p661_p11, %p658_p10 }
  0x3a   :  { %666 = shalt.err (!%p663_p12)
}
  0x3b   :  { %s667_s1 = scalar_lea.vmem %s60_s17, 1024  ;;  %p672_p0 = scmp.lt.s32.totalorder %s60_s17, %s60_s17 }
  0x3c   :  { %p668_p13 = scmp.ne.s32.totalorder %s60_s17, %s667_s1  ;;  %p673_p1 = scmp.lt.s32.totalorder %s667_s1, %s667_s1 }
  0x3e   :  { %p674_p2 = por %p673_p1, %p672_p0 }
  0x40   :  { %p675_p3 = pnand %p674_p2, %p668_p13 }
  0x42   :  { %678 = shalt.err (!%p675_p3)
}
  0x43   :  { %65 = dma.hbm_to_vmem [thread:$0]  %s871_s5, 1024, %s60_s17, [#allocation9], %s710_s11, %s710_s11, %s711_s12  }
  0x44   :  { %701 = dma.done.wait [#allocation3], 64  }
  0x45   :  { %702 = vsyncadd [#allocation3], 4294967232 }
  0x46   :  { %703 = dma.done.wait [#allocation6], 2048  }
  0x47   :  { %704 = vsyncadd [#allocation6], 4294965248 }
  0x48   :  { %705 = dma.done.wait [#allocation9], 1024  }
  0x49   :  { %706 = vsyncadd [#allocation9], 4294966272  ;;  %v715_v0 = vmov 0.0   ;;  %vm716_vm0 = vmmov 0   ;;  %v567_v1 = vld [vmem:[#allocation5] sm:$0xff]   ;;  %v568_v2 = vld [vmem:[#allocation5 + $0x8] sm:$0xff]  }
  0x4a   :  { %498 = vmatprep.subr.bf16.mxu0 %v715_v0  ;;  %514 = vmatprep.mubr.msk.bf16.mxu0 %vm716_vm0, %v715_v0  ;;  %v569_v3 = vld [vmem:[#allocation5 + $0x10] sm:$0xff]   ;;  %v575_v4 = vld [vmem:[#allocation7] sm:$0xff]   ;;  %v570_v5 = vld [vmem:[#allocation5 + $0x18] sm:$0xff]   ;;  %s717_s28 = smov [#allocation10]  }
  0x4b   :  { %518 = vmatprep.subr.bf16.mxu1 %v715_v0  ;;  %534 = vmatprep.mubr.msk.bf16.mxu1 %vm716_vm0, %v715_v0  ;;  %v576_v6 = vld [vmem:[#allocation7 + $0x8] sm:$0xff]   ;;  %v571_v7 = vld [vmem:[#allocation5 + $0x20] sm:$0xff]   ;;  %v577_v8 = vld [vmem:[#allocation7 + $0x10] sm:$0xff]   ;;  %s433_s29 = sshll.u32 %s717_s28, 4  ;;  %s434_s29 = int_to_ptr.vmem [resolvable:$true] %s433_s29 }
  0x4c   :  { %499 = vmatpush3.bf16.msra.mxu0 %v567_v1  ;;  %519 = vmatpush3.bf16.msra.mxu1 %v575_v4  ;;  %v572_v9 = vld [vmem:[#allocation5 + $0x28] sm:$0xff]   ;;  %v578_v10 = vld [vmem:[#allocation7 + $0x18] sm:$0xff]   ;;  %v573_v11 = vld [vmem:[#allocation5 + $0x30] sm:$0xff]   ;;  %p684_p5 = scmp.lt.s32.totalorder %s434_s29, %s434_s29 }
  0x4d   :  { %500 = vmatprep.subr.bf16.mxu0 %v715_v0  ;;  %520 = vmatprep.subr.bf16.mxu1 %v715_v0  ;;  %v579_v12 = vld [vmem:[#allocation7 + $0x20] sm:$0xff]   ;;  %v574_v13 = vld [vmem:[#allocation5 + $0x38] sm:$0xff]   ;;  %v580_v14 = vld [vmem:[#allocation7 + $0x28] sm:$0xff]  }
  0x4e   :  { %v81_v15 = vld [vmem:[#allocation2] sm:$0xf]  ;;  %v581_v16 = vld [vmem:[#allocation7 + $0x30] sm:$0xff]   ;;  %v583_v18 = vld [vmem:[#allocation8] sm:$0xff]  }
  0x4f   :  { %v582_v17 = vld [vmem:[#allocation7 + $0x38] sm:$0xff]   ;;  %v584_v19 = vld [vmem:[#allocation8 + $0x8] sm:$0xff]   ;;  %v585_v20 = vld [vmem:[#allocation8 + $0x10] sm:$0xff]  }
  0x50   :  { %501 = vmatpush3.bf16.msra.mxu0 %v568_v2  ;;  %521 = vmatpush3.bf16.msra.mxu1 %v576_v6  ;;  %v586_v21 = vld [vmem:[#allocation8 + $0x18] sm:$0xff]   ;;  %v587_v22 = vld [vmem:[#allocation8 + $0x20] sm:$0xff]   ;;  %v588_v23 = vld [vmem:[#allocation8 + $0x28] sm:$0xff]  }
  0x51   :  { %502 = vmatprep.subr.bf16.mxu0 %v715_v0  ;;  %522 = vmatprep.subr.bf16.mxu1 %v715_v0  ;;  %v444_v24 = vld [vmem:[%s868_s2] ss:$0 sm:$0xff]  ;;  %v589_v33 = vld [vmem:[#allocation8 + $0x30] sm:$0xff]  }
  0x52   :  { %v590_v34 = vld [vmem:[#allocation8 + $0x38] sm:$0xff]  }
  0x53   :  { %v453_v35 = vld [vmem:[%s870_s4] ss:$0 sm:$0xff]  ;;  %s679_s4 = scalar_lea.vmem %s434_s29, 128 }
  0x54   :  { %503 = vmatpush3.bf16.msra.mxu0 %v569_v3  ;;  %523 = vmatpush3.bf16.msra.mxu1 %v577_v8  ;;  %v462_v44 = vld [vmem:[%s872_s6] ss:$0 sm:$0xff]  ;;  %p680_p4 = scmp.ne.s32.totalorder %s434_s29, %s679_s4  ;;  %p685_p6 = scmp.lt.s32.totalorder %s679_s4, %s679_s4 }
  0x55   :  { %504 = vmatprep.subr.bf16.mxu0 %v715_v0  ;;  %524 = vmatprep.subr.bf16.mxu1 %v715_v0 }
  0x56   :  { %p686_p7 = por %p685_p6, %p684_p5 }
  0x58   :  { %505 = vmatpush3.bf16.msra.mxu0 %v570_v5  ;;  %525 = vmatpush3.bf16.msra.mxu1 %v578_v10  ;;  %p687_p8 = pnand %p686_p7, %p680_p4 }
  0x59   :  { %506 = vmatprep.subr.bf16.mxu0 %v715_v0  ;;  %526 = vmatprep.subr.bf16.mxu1 %v715_v0 }
  0x5c   :  { %507 = vmatpush3.bf16.msra.mxu0 %v571_v7  ;;  %527 = vmatpush3.bf16.msra.mxu1 %v579_v12 }
  0x5d   :  { %508 = vmatprep.subr.bf16.mxu0 %v715_v0  ;;  %528 = vmatprep.subr.bf16.mxu1 %v715_v0 }
  0x60   :  { %509 = vmatpush3.bf16.msra.mxu0 %v572_v9  ;;  %529 = vmatpush3.bf16.msra.mxu1 %v580_v14 }
  0x61   :  { %510 = vmatprep.subr.bf16.mxu0 %v715_v0  ;;  %530 = vmatprep.subr.bf16.mxu1 %v715_v0 }
  0x64   :  { %511 = vmatpush3.bf16.msra.mxu0 %v573_v11  ;;  %531 = vmatpush3.bf16.msra.mxu1 %v581_v16 }
  0x65   :  { %512 = vmatprep.subr.bf16.mxu0 %v715_v0  ;;  %532 = vmatprep.subr.bf16.mxu1 %v715_v0 }
  0x68   :  { %513 = vmatpush3.bf16.msra.mxu0 %v574_v13  ;;  %533 = vmatpush3.bf16.msra.mxu1 %v582_v17 }
  0x69   :  { %538 = vmatprep.subr.bf16.mxu0 %v715_v0 }
  0x6b   :  { %515 = vmatmul.mubr.bf16.vlgmr.msra.gmra.mrb[0].mxu0 %v81_v15 }
  0x6c   :  { %554 = vmatprep.mubr.msk.bf16.mxu0 %vm716_vm0, %v715_v0  ;;  %539 = vmatpush3.bf16.msra.mxu0 %v583_v18 }
  0x6d   :  { %540 = vmatprep.subr.bf16.mxu0 %v715_v0 }
  0x70   :  { %541 = vmatpush3.bf16.msra.mxu0 %v584_v19 }
  0x71   :  { %542 = vmatprep.subr.bf16.mxu0 %v715_v0 }
  0x74   :  { %543 = vmatpush3.bf16.msra.mxu0 %v585_v20 }
  0x75   :  { %544 = vmatprep.subr.bf16.mxu0 %v715_v0 }
  0x78   :  { %545 = vmatpush3.bf16.msra.mxu0 %v586_v21 }
  0x79   :  { %546 = vmatprep.subr.bf16.mxu0 %v715_v0 }
  0x7c   :  { %547 = vmatpush3.bf16.msra.mxu0 %v587_v22 }
  0x7d   :  { %548 = vmatprep.subr.bf16.mxu0 %v715_v0 }
  0x80   :  { %549 = vmatpush3.bf16.msra.mxu0 %v588_v23 }
  0x81   :  { %550 = vmatprep.subr.bf16.mxu0 %v715_v0 }
  0x84   :  { %551 = vmatpush3.bf16.msra.mxu0 %v589_v33 }
  0x85   :  { %552 = vmatprep.subr.bf16.mxu0 %v715_v0 }
  0x88   :  { %553 = vmatpush3.bf16.msra.mxu0 %v590_v34 }
 0x13e   :  { %v187_v25 = vpop.f32.mrb[0].mxu0 }
 0x13f   :  { %v188_v26 = vadd.f32 %v444_v24, %v187_v25  ;;  %v516_v27 = vpop.f32.mrb[1].mxu0 }
 0x140   :  { %v190_v28 = vpop.f32.mrb[2].mxu0 }
 0x141   :  { %vm193_vm1 = vcmp.ge.f32.partialorder %v188_v26, 0.0  ;;  %v194_v29 = vmul.f32 0.1, %v188_v26  ;;  %v517_v30 = vpop.f32.mrb[3].mxu0 }
 0x143   :  { %v195_v31 = vsel %vm193_vm1, %v188_v26, %v194_v29 }
 0x144   :  { %v196_v32 = vpack.c.bf16 %v195_v31, %v195_v31 }
 0x146   :  { %535 = vmatmul.mubr.bf16.vlgmr.msra.gmra.mrb[0].mxu1 %v196_v32 }
 0x219   :  { %v302_v36 = vpop.f32.mrb[0].mxu1 }
 0x21a   :  { %v303_v37 = vadd.f32 %v453_v35, %v302_v36  ;;  %v536_v38 = vpop.f32.mrb[1].mxu1 }
 0x21b   :  { %v305_v39 = vpop.f32.mrb[2].mxu1 }
 0x21c   :  { %vm308_vm2 = vcmp.ge.f32.partialorder %v303_v37, 0.0  ;;  %v309_v40 = vmul.f32 0.1, %v303_v37  ;;  %v537_v41 = vpop.f32.mrb[3].mxu1 }
 0x21e   :  { %v310_v42 = vsel %vm308_vm2, %v303_v37, %v309_v40 }
 0x21f   :  { %v311_v43 = vpack.c.bf16 %v310_v42, %v310_v42 }
 0x221   :  { %555 = vmatmul.mubr.bf16.vlgmr.msra.gmra.mrb[4].mxu0 %v311_v43 }
 0x2f4   :  { %v417_v45 = vpop.f32.mrb[4].mxu0 }
 0x2f5   :  { %v418_v46 = vadd.f32 %v462_v44, %v417_v45  ;;  %v556_v47 = vpop.f32.mrb[5].mxu0 }
 0x2f6   :  { %v420_v48 = vpop.f32.mrb[6].mxu0 }
 0x2f7   :  { %v424_v49 = vmul.f32 0.1, %v418_v46  ;;  %v557_v50 = vpop.f32.mrb[7].mxu0  ;;  %vm423_vm3 = vcmp.ge.f32.partialorder %v418_v46, 0.0 }
 0x2f9   :  { %v425_v51 = vsel %vm423_vm3, %v418_v46, %v424_v49 }
 0x2fa   :  { %426 = vst [vmem:[#allocation10] sm:$0xff] %v425_v51 }
 0x2fb   :  { %690 = shalt.err (!%p687_p8)
}
 0x2fc   :  { %s691_s8 = scalar_lea.hbm %s873_s7, 128 }
 0x2fd   :  { %p692_p9 = scmp.ne.s32.totalorder %s873_s7, %s691_s8  ;;  %p695_p10 = scmp.lt.u32.totalorder %s691_s8, %s873_s7 }
 0x2ff   :  { %p697_p11 = pnand %p695_p10, %p692_p9 }
 0x301   :  { %700 = shalt.err (!%p697_p11)
}
 0x302   :  { %436 = dma.vmem_to_hbm [thread:$0]  %s434_s29, 128, %s873_s7, [#allocation4]  }
 0x303   :  { %707 = dma.done.wait [#allocation4], 128  }
 0x304   :  { %708 = vsyncadd [#allocation4], 4294967168 }
 0x305   :  { %440 = vsyncpa [#allocation3], 1 }
 0x306   :  { %441 = vsyncpa [#allocation6], 1 }
 0x307   :  { %442 = vsyncpa [#allocation9], 1 }
 0x308   :  { %443 = vsyncpa [#allocation4], 1 }

</bundles_post_ra>
